<compile_context>
chip_gen: v7x
topology: tpu7x:2x2x1
jax: 0.10.0
libtpu: 0.0.40
codegen_flags: <defaults>
</compile_context>

<pallas_src>
import functools

import jax
import jax.numpy as jnp
from jax.experimental import pallas as pl
from jax.experimental.pallas import tpu as pltpu


def _round_up(x, m):
    return (x + m - 1) // m * m


def _kernel(tt, tb,
            meta_ref, tok_ref,
            w1_ref, b1_ref, w2_ref, b2_ref, w3_ref, b3_ref,
            out_ref, acc_ref):
    kt = pl.program_id(1)

    @pl.when(kt == 0)
    def _():
        acc_ref[...] = jnp.zeros_like(acc_ref)

    # Rebuild the (TB, TT) 0/1 bag-membership tile from per-bag [start, end) (VPU work that
    # hides under the MXU slot; avoids streaming a dense (B, T) matrix from HBM).  The 1/count
    # mean scaling is deferred to the finalize step, so this is a plain 0/1 mask.
    meta = meta_ref[...]                                   # (TB, 3) f32: start, end, 1/count
    starts = meta[:, 0:1].astype(jnp.int32)
    ends = meta[:, 1:2].astype(jnp.int32)
    pos = kt * tt + jax.lax.broadcasted_iota(jnp.int32, (tb, tt), 1)
    in_bag = (pos >= starts) & (pos < ends)
    bag01 = jnp.where(in_bag, 1.0, 0.0).astype(jnp.bfloat16)

    # EmbeddingBag partial sum over this token tile, f32 accumulation on the MXU.
    acc_ref[...] += jnp.dot(bag01, tok_ref[...], preferred_element_type=jnp.float32)

    # Finalize: exact f32 mean scaling + 3-layer MLP (bf16 operands, f32 accumulate / ReLU).
    @pl.when(kt == pl.num_programs(1) - 1)
    def _():
        invc = meta[:, 2:3]                                # (TB, 1) f32
        pooled = (acc_ref[...] * invc).astype(jnp.bfloat16)
        h1 = jnp.dot(pooled, w1_ref[...], preferred_element_type=jnp.float32) + b1_ref[...]
        h1 = jnp.maximum(h1, 0.0).astype(jnp.bfloat16)
        h2 = jnp.dot(h1, w2_ref[...], preferred_element_type=jnp.float32) + b2_ref[...]
        h2 = jnp.maximum(h2, 0.0).astype(jnp.bfloat16)
        out_ref[...] = jnp.dot(h2, w3_ref[...], preferred_element_type=jnp.float32) + b3_ref[...]


def text_classification_forward(params, text, offsets, *, tb_max=512, tt_max=2048):
    """Forward pass matching TextClassificationModel2D.forward(text, offsets).

    text:    int32 (T,)  flat token indices
    offsets: int32 (B,)  start offset of each bag (sorted ascending, offsets[0] == 0)
    returns: float32 (B, num_class)
    """
    emb_table, w1, b1, w2, b2, w3, b3 = params
    T = int(text.shape[0])
    B = int(offsets.shape[0])
    D = int(emb_table.shape[1])
    H = int(w1.shape[1])
    C = int(w3.shape[1])

    # ---- tiling / padding: lane-dense last dims (x128), sublane-friendly batch tile (x8) ----
    TB = min(_round_up(tb_max, 8), _round_up(B, 8))
    B_pad = _round_up(B, TB)
    TT = min(_round_up(tt_max, 128), _round_up(T, 128))
    T_pad = _round_up(T, TT)
    D_pad = _round_up(D, 128)
    H_pad = _round_up(H, 128)
    C_pad = _round_up(C, 128)
    nb = B_pad // TB
    nt = T_pad // TT

    # ---- glue (plain JAX): embedding gather + packed per-bag (start, end, 1/count) ----
    # TODO(synk): fuse the embedding-row gather into the kernel (scalar-prefetch token ids +
    # emb_table in pl.ANY with per-tile DMA) to drop the extra (T, D) HBM write+read; at
    # D_pad*2-byte rows a per-row DMA gather is descriptor-bound, so XLA's gather is kept.
    tok_emb = jnp.take(emb_table, text, axis=0).astype(jnp.bfloat16)            # (T, D)
    tok_emb = jnp.pad(tok_emb, ((0, T_pad - T), (0, D_pad - D)))                 # (T_pad, D_pad)

    starts = offsets.astype(jnp.float32)                                         # exact ints in f32
    ends = jnp.concatenate([starts[1:], jnp.array([T], jnp.float32)])
    inv_counts = 1.0 / jnp.maximum(ends - starts, 1.0)                           # empty bag -> 0 pool
    meta = jnp.stack([starts, ends, inv_counts], axis=1)                         # (B, 3)
    meta = jnp.pad(meta, ((0, B_pad - B), (0, 0)))                               # pad rows: empty bags

    # ---- weights: bf16 matmul operands, f32 biases, zero-padded to lane-dense shapes ----
    w1p = jnp.pad(w1, ((0, D_pad - D), (0, H_pad - H))).astype(jnp.bfloat16)
    w2p = jnp.pad(w2, ((0, H_pad - H), (0, H_pad - H))).astype(jnp.bfloat16)
    w3p = jnp.pad(w3, ((0, H_pad - H), (0, C_pad - C))).astype(jnp.bfloat16)
    b1p = jnp.pad(b1, ((0, 0), (0, H_pad - H))).astype(jnp.float32)
    b2p = jnp.pad(b2, ((0, 0), (0, H_pad - H))).astype(jnp.float32)
    b3p = jnp.pad(b3, ((0, 0), (0, C_pad - C))).astype(jnp.float32)

    # ---- VMEM accounting (double-buffered BlockSpec tiles + accumulator scratch) ----
    # TODO(synk): on v7x (64 MiB VMEM) with large H, single-buffer the resident W1/W2/W3/b*
    # BlockSpecs via pipeline_mode=pl.Buffered(1); not needed at these shapes.
    def _tile_bytes(r, c, elt):
        return _round_up(r, 8) * _round_up(c, 128) * elt

    vmem_bytes = (2 * _tile_bytes(TB, 3, 4)                 # packed bag metadata
                  + 2 * _tile_bytes(TT, D_pad, 2)           # token-embedding tile
                  + 2 * (_tile_bytes(D_pad, H_pad, 2)
                         + _tile_bytes(H_pad, H_pad, 2)
                         + _tile_bytes(H_pad, C_pad, 2))    # W1 / W2 / W3
                  + 2 * (2 * _tile_bytes(1, H_pad, 4) + _tile_bytes(1, C_pad, 4))  # biases
                  + 2 * _tile_bytes(TB, C_pad, 4)           # output tile
                  + _tile_bytes(TB, D_pad, 4))              # pooled accumulator
    vmem_limit = int(min(96 * 1024 * 1024, max(2 * vmem_bytes, 16 * 1024 * 1024)))

    # ---- advisory cost hint (tok_emb is re-streamed once per batch tile: nb factor) ----
    flops = (2 * B_pad * T_pad * D_pad
             + 2 * B_pad * (D_pad * H_pad + H_pad * H_pad + H_pad * C_pad))
    bytes_accessed = (B_pad * 3 * 4
                      + nb * T_pad * D_pad * 2
                      + (D_pad * H_pad + H_pad * H_pad + H_pad * C_pad) * 2
                      + (2 * H_pad + C_pad) * 4
                      + B_pad * C_pad * 4)

    out = pl.pallas_call(
        functools.partial(_kernel, TT, TB),
        out_shape=jax.ShapeDtypeStruct((B_pad, C_pad), jnp.float32),
        grid=(nb, nt),
        in_specs=[
            pl.BlockSpec((TB, 3), lambda bi, kt: (bi, 0)),        # (start, end, 1/count) per bag
            pl.BlockSpec((TT, D_pad), lambda bi, kt: (kt, 0)),    # token embeddings (bf16)
            pl.BlockSpec((D_pad, H_pad), lambda bi, kt: (0, 0)),  # W1 (bf16, resident)
            pl.BlockSpec((1, H_pad), lambda bi, kt: (0, 0)),      # b1 (f32)
            pl.BlockSpec((H_pad, H_pad), lambda bi, kt: (0, 0)),  # W2 (bf16, resident)
            pl.BlockSpec((1, H_pad), lambda bi, kt: (0, 0)),      # b2 (f32)
            pl.BlockSpec((H_pad, C_pad), lambda bi, kt: (0, 0)),  # W3 (bf16, resident)
            pl.BlockSpec((1, C_pad), lambda bi, kt: (0, 0)),      # b3 (f32)
        ],
        out_specs=pl.BlockSpec((TB, C_pad), lambda bi, kt: (bi, 0)),
        scratch_shapes=[pltpu.VMEM((TB, D_pad), jnp.float32)],    # pooled accumulator
        compiler_params=pltpu.CompilerParams(
            dimension_semantics=("parallel", "arbitrary"),
            vmem_limit_bytes=vmem_limit),
        cost_estimate=pl.CostEstimate(flops=flops, transcendentals=0,
                                      bytes_accessed=bytes_accessed),
    )(meta, tok_emb, w1p, b1p, w2p, b2p, w3p, b3p)

    return out[:B, :C]


def init_params(key, vocab_size, embed_dim, H, num_class):
    """Mirror TextClassificationModel2D.init_weights(): uniform(-5, 5), zero biases."""
    initrange = 5.0
    k0, k1, k2, k3 = jax.random.split(key, 4)
    emb_table = jax.random.uniform(k0, (vocab_size, embed_dim), jnp.float32, -initrange, initrange)
    # linear weights stored as (in, out) == torch weight.T
    w1 = jax.random.uniform(k1, (embed_dim, H), jnp.float32, -initrange, initrange)
    b1 = jnp.zeros((1, H), jnp.float32)
    w2 = jax.random.uniform(k2, (H, H), jnp.float32, -initrange, initrange)
    b2 = jnp.zeros((1, H), jnp.float32)
    w3 = jax.random.uniform(k3, (H, num_class), jnp.float32, -initrange, initrange)
    b3 = jnp.zeros((1, num_class), jnp.float32)
    return (emb_table, w1, b1, w2, b2, w3, b3)


def _bag_mask_and_inv(text, offsets):
    T = text.shape[0]
    starts = offsets.astype(jnp.int32)
    ends = jnp.concatenate([starts[1:], jnp.array([T], jnp.int32)])
    pos = jnp.arange(T, dtype=jnp.int32)
    mask = (pos[None, :] >= starts[:, None]) & (pos[None, :] < ends[:, None])   # (B, T)
    inv = 1.0 / jnp.maximum((ends - starts).astype(jnp.float32), 1.0)           # (B,)
    return mask, inv


def _reference_f32(params, text, offsets):
    """Pure-JAX f32 reference (exact PyTorch semantics)."""
    emb_table, w1, b1, w2, b2, w3, b3 = params
    tok = jnp.take(emb_table, text, axis=0)
    mask, inv = _bag_mask_and_inv(text, offsets)
    pooled = (mask.astype(jnp.float32) @ tok) * inv[:, None]
    h1 = jnp.maximum(pooled @ w1 + b1, 0.0)
    h2 = jnp.maximum(h1 @ w2 + b2, 0.0)
    return h2 @ w3 + b3


def _reference_bf16(params, text, offsets):
    """Pure-JAX reference matching the kernel's bf16-operand / f32-accumulate path."""
    emb_table, w1, b1, w2, b2, w3, b3 = params
    tok = jnp.take(emb_table, text, axis=0).astype(jnp.bfloat16)
    mask, inv = _bag_mask_and_inv(text, offsets)
    sums = jnp.dot(jnp.where(mask, 1.0, 0.0).astype(jnp.bfloat16), tok,
                   preferred_element_type=jnp.float32)
    pooled = (sums * inv[:, None]).astype(jnp.bfloat16)
    h1 = jnp.dot(pooled, w1.astype(jnp.bfloat16), preferred_element_type=jnp.float32) + b1
    h1 = jnp.maximum(h1, 0.0).astype(jnp.bfloat16)
    h2 = jnp.dot(h1, w2.astype(jnp.bfloat16), preferred_element_type=jnp.float32) + b2
    h2 = jnp.maximum(h2, 0.0).astype(jnp.bfloat16)
    return jnp.dot(h2, w3.astype(jnp.bfloat16), preferred_element_type=jnp.float32) + b3


if __name__ == "__main__":
    vocab_size, embed_dim, H, num_class = 50, 32, 32, 4

    key = jax.random.PRNGKey(0)
    pkey, tkey, okey = jax.random.split(key, 3)
    params = init_params(pkey, vocab_size, embed_dim, H, num_class)

    # --- case 1: tiny shapes from the spec (2 bags over an 8-token flat sequence) ---
    batch, seq = 2, 8
    text = jax.random.randint(tkey, (seq,), 0, vocab_size, dtype=jnp.int32)
    offsets = jnp.array([0, 5], dtype=jnp.int32)  # bag0 = tokens[0:5], bag1 = tokens[5:8]

    out = jax.block_until_ready(text_classification_forward(params, text, offsets))
    assert out.shape == (batch, num_class), out.shape

    ref_bf16 = _reference_bf16(params, text, offsets)
    assert jnp.allclose(out, ref_bf16, rtol=2e-2, atol=2e-2), (out, ref_bf16)

    ref_f32 = _reference_f32(params, text, offsets)
    rel = jnp.max(jnp.abs(out - ref_f32)) / (jnp.max(jnp.abs(ref_f32)) + 1e-6)
    assert rel < 0.25, rel

    # --- case 2: exercise multi-tile token accumulation (nt>1), nb>1, padded & empty bags ---
    batch2, seq2 = 10, 300
    t2key, o2key = jax.random.split(okey)
    text2 = jax.random.randint(t2key, (seq2,), 0, vocab_size, dtype=jnp.int32)
    offsets2 = jnp.concatenate([
        jnp.zeros((1,), jnp.int32),
        jnp.sort(jax.random.randint(o2key, (batch2 - 1,), 0, seq2, dtype=jnp.int32))])

    out2 = jax.block_until_ready(
        text_classification_forward(params, text2, offsets2, tb_max=8, tt_max=128))
    assert out2.shape == (batch2, num_class), out2.shape

    ref2 = _reference_bf16(params, text2, offsets2)
    err2 = jnp.max(jnp.abs(out2 - ref2)) / (jnp.max(jnp.abs(ref2)) + 1e-6)
    assert err2 < 2e-2, err2

    print("KERNEL_OK")
</pallas_src>

<mosaic_0001>
module attributes {stable_mosaic.version = 11 : i64} {
  func.func @_kernel(%arg0: i32, %arg1: i32, %arg2: memref<8x3xf32, #tpu.memory_space<vmem>>, %arg3: memref<128x128xbf16, #tpu.memory_space<vmem>>, %arg4: memref<128x128xbf16, #tpu.memory_space<vmem>>, %arg5: memref<1x128xf32, #tpu.memory_space<vmem>>, %arg6: memref<128x128xbf16, #tpu.memory_space<vmem>>, %arg7: memref<1x128xf32, #tpu.memory_space<vmem>>, %arg8: memref<128x128xbf16, #tpu.memory_space<vmem>>, %arg9: memref<1x128xf32, #tpu.memory_space<vmem>>, %arg10: memref<8x128xf32, #tpu.memory_space<vmem>>, %arg11: memref<8x128xf32, #tpu.memory_space<vmem>>) attributes {dimension_semantics = [#tpu.dimension_semantics<parallel>, #tpu.dimension_semantics<arbitrary>], iteration_bounds = array<i64: 1, 1>, scalar_prefetch = 0 : i64, scratch_operands = 1 : i64, tpu.core_type = #tpu.core_type<tc>, window_params = [{transform_indices = @transform_0, window_bounds = array<i64: 8, 3>}, {transform_indices = @transform_1, window_bounds = array<i64: 128, 128>}, {pipeline_mode = #tpu.pipeline_mode<synchronous>, transform_indices = @transform_2, window_bounds = array<i64: 128, 128>}, {pipeline_mode = #tpu.pipeline_mode<synchronous>, transform_indices = @transform_3, window_bounds = array<i64: 1, 128>}, {pipeline_mode = #tpu.pipeline_mode<synchronous>, transform_indices = @transform_4, window_bounds = array<i64: 128, 128>}, {pipeline_mode = #tpu.pipeline_mode<synchronous>, transform_indices = @transform_5, window_bounds = array<i64: 1, 128>}, {pipeline_mode = #tpu.pipeline_mode<synchronous>, transform_indices = @transform_6, window_bounds = array<i64: 128, 128>}, {pipeline_mode = #tpu.pipeline_mode<synchronous>, transform_indices = @transform_7, window_bounds = array<i64: 1, 128>}, {transform_indices = @transform_8, window_bounds = array<i64: 8, 128>}]} {
    %c0_i32 = arith.constant 0 : i32
    %0 = arith.cmpi eq, %arg1, %c0_i32 : i32
    %1 = arith.extui %0 : i1 to i32
    %c0_i32_0 = arith.constant 0 : i32
    %2 = arith.cmpi ne, %1, %c0_i32_0 : i32
    scf.if %2 {
      %cst_12 = arith.constant 0.000000e+00 : f32
      %29 = vector.broadcast %cst_12 : f32 to vector<8x128xf32>
      %c0_13 = arith.constant 0 : index
      %c0_14 = arith.constant 0 : index
      %30 = vector.load %arg11[%c0_13, %c0_14] : memref<8x128xf32, #tpu.memory_space<vmem>>, vector<8x128xf32>
      tpu.vector_store %arg11[%c0_13, %c0_14], %29 {strides = array<i32>} : memref<8x128xf32, #tpu.memory_space<vmem>>, vector<8x128xf32>,
    } else {
    }
    %c0 = arith.constant 0 : index
    %c0_1 = arith.constant 0 : index
    %3 = vector.load %arg2[%c0, %c0_1] : memref<8x3xf32, #tpu.memory_space<vmem>>, vector<8x3xf32>
    %4 = vector.extract_strided_slice %3 {offsets = [0, 0], sizes = [8, 1], strides = [1, 1]} : vector<8x3xf32> to vector<8x1xf32>
    %5 = arith.fptosi %4 : vector<8x1xf32> to vector<8x1xi32>
    %6 = vector.extract_strided_slice %3 {offsets = [0, 1], sizes = [8, 1], strides = [1, 1]} : vector<8x3xf32> to vector<8x1xf32>
    %7 = arith.fptosi %6 : vector<8x1xf32> to vector<8x1xi32>
    %c128_i32 = arith.constant 128 : i32
    %8 = arith.muli %arg1, %c128_i32 : i32
    %9 = tpu.iota {dimensions = array<i32: 1>} : vector<8x128xi32>
    %10 = vector.broadcast %8 : i32 to vector<8x128xi32>
    %11 = arith.addi %10, %9 : vector<8x128xi32>
    %12 = vector.broadcast %5 : vector<8x1xi32> to vector<8x128xi32>
    %13 = arith.cmpi sge, %11, %12 : vector<8x128xi32>
    %14 = vector.broadcast %7 : vector<8x1xi32> to vector<8x128xi32>
    %15 = arith.cmpi slt, %11, %14 : vector<8x128xi32>
    %16 = arith.andi %13, %15 : vector<8x128xi1>
    %cst = arith.constant 1.000000e+00 : f32
    %cst_2 = arith.constant 0.000000e+00 : f32
    %17 = vector.broadcast %cst : f32 to vector<8x128xf32>
    %18 = vector.broadcast %cst_2 : f32 to vector<8x128xf32>
    %19 = arith.select %16, %17, %18 : vector<8x128xi1>, vector<8x128xf32>
    %20 = arith.truncf %19 : vector<8x128xf32> to vector<8x128xbf16>
    %c0_3 = arith.constant 0 : index
    %c0_4 = arith.constant 0 : index
    %21 = vector.load %arg11[%c0_3, %c0_4] : memref<8x128xf32, #tpu.memory_space<vmem>>, vector<8x128xf32>
    %c0_5 = arith.constant 0 : index
    %c0_6 = arith.constant 0 : index
    %22 = vector.load %arg3[%c0_5, %c0_6] : memref<128x128xbf16, #tpu.memory_space<vmem>>, vector<128x128xbf16>
    %cst_7 = arith.constant dense<0.000000e+00> : vector<8x128xf32>
    %23 = tpu.matmul %20, %22, %cst_7 {dimension_numbers = #tpu.dot_dimension_numbers<[1], [0], [0], [1], [0, 0, 1, 1], [], []>} : vector<8x128xbf16>, vector<128x128xbf16>, vector<8x128xf32> -> vector<8x128xf32>
    %24 = arith.addf %21, %23 : vector<8x128xf32>
    %c0_8 = arith.constant 0 : index
    %c0_9 = arith.constant 0 : index
    %25 = vector.load %arg11[%c0_8, %c0_9] : memref<8x128xf32, #tpu.memory_space<vmem>>, vector<8x128xf32>
    tpu.vector_store %arg11[%c0_8, %c0_9], %24 {strides = array<i32>} : memref<8x128xf32, #tpu.memory_space<vmem>>, vector<8x128xf32>,
    %c0_i32_10 = arith.constant 0 : i32
    %26 = arith.cmpi eq, %arg1, %c0_i32_10 : i32
    %27 = arith.extui %26 : i1 to i32
    %c0_i32_11 = arith.constant 0 : i32
    %28 = arith.cmpi ne, %27, %c0_i32_11 : i32
    scf.if %28 {
      %29 = vector.extract_strided_slice %3 {offsets = [0, 2], sizes = [8, 1], strides = [1, 1]} : vector<8x3xf32> to vector<8x1xf32>
      %c0_12 = arith.constant 0 : index
      %c0_13 = arith.constant 0 : index
      %30 = vector.load %arg11[%c0_12, %c0_13] : memref<8x128xf32, #tpu.memory_space<vmem>>, vector<8x128xf32>
      %31 = vector.broadcast %29 : vector<8x1xf32> to vector<8x128xf32>
      %32 = arith.mulf %30, %31 : vector<8x128xf32>
      %33 = arith.truncf %32 : vector<8x128xf32> to vector<8x128xbf16>
      %c0_14 = arith.constant 0 : index
      %c0_15 = arith.constant 0 : index
      %34 = vector.load %arg4[%c0_14, %c0_15] : memref<128x128xbf16, #tpu.memory_space<vmem>>, vector<128x128xbf16>
      %cst_16 = arith.constant dense<0.000000e+00> : vector<8x128xf32>
      %35 = tpu.matmul %33, %34, %cst_16 {dimension_numbers = #tpu.dot_dimension_numbers<[1], [0], [0], [1], [0, 0, 1, 1], [], []>} : vector<8x128xbf16>, vector<128x128xbf16>, vector<8x128xf32> -> vector<8x128xf32>
      %c0_17 = arith.constant 0 : index
      %c0_18 = arith.constant 0 : index
      %36 = vector.load %arg5[%c0_17, %c0_18] : memref<1x128xf32, #tpu.memory_space<vmem>>, vector<1x128xf32>
      %37 = vector.broadcast %36 : vector<1x128xf32> to vector<8x128xf32>
      %38 = arith.addf %35, %37 : vector<8x128xf32>
      %cst_19 = arith.constant 0.000000e+00 : f32
      %39 = vector.broadcast %cst_19 : f32 to vector<8x128xf32>
      %40 = arith.maximumf %38, %39 : vector<8x128xf32>
      %41 = arith.truncf %40 : vector<8x128xf32> to vector<8x128xbf16>
      %c0_20 = arith.constant 0 : index
      %c0_21 = arith.constant 0 : index
      %42 = vector.load %arg6[%c0_20, %c0_21] : memref<128x128xbf16, #tpu.memory_space<vmem>>, vector<128x128xbf16>
      %cst_22 = arith.constant dense<0.000000e+00> : vector<8x128xf32>
      %43 = tpu.matmul %41, %42, %cst_22 {dimension_numbers = #tpu.dot_dimension_numbers<[1], [0], [0], [1], [0, 0, 1, 1], [], []>} : vector<8x128xbf16>, vector<128x128xbf16>, vector<8x128xf32> -> vector<8x128xf32>
      %c0_23 = arith.constant 0 : index
      %c0_24 = arith.constant 0 : index
      %44 = vector.load %arg7[%c0_23, %c0_24] : memref<1x128xf32, #tpu.memory_space<vmem>>, vector<1x128xf32>
      %45 = vector.broadcast %44 : vector<1x128xf32> to vector<8x128xf32>
      %46 = arith.addf %43, %45 : vector<8x128xf32>
      %cst_25 = arith.constant 0.000000e+00 : f32
      %47 = vector.broadcast %cst_25 : f32 to vector<8x128xf32>
      %48 = arith.maximumf %46, %47 : vector<8x128xf32>
      %49 = arith.truncf %48 : vector<8x128xf32> to vector<8x128xbf16>
      %c0_26 = arith.constant 0 : index
      %c0_27 = arith.constant 0 : index
      %50 = vector.load %arg8[%c0_26, %c0_27] : memref<128x128xbf16, #tpu.memory_space<vmem>>, vector<128x128xbf16>
      %cst_28 = arith.constant dense<0.000000e+00> : vector<8x128xf32>
      %51 = tpu.matmul %49, %50, %cst_28 {dimension_numbers = #tpu.dot_dimension_numbers<[1], [0], [0], [1], [0, 0, 1, 1], [], []>} : vector<8x128xbf16>, vector<128x128xbf16>, vector<8x128xf32> -> vector<8x128xf32>
      %c0_29 = arith.constant 0 : index
      %c0_30 = arith.constant 0 : index
      %52 = vector.load %arg9[%c0_29, %c0_30] : memref<1x128xf32, #tpu.memory_space<vmem>>, vector<1x128xf32>
      %53 = vector.broadcast %52 : vector<1x128xf32> to vector<8x128xf32>
      %54 = arith.addf %51, %53 : vector<8x128xf32>
      %c0_31 = arith.constant 0 : index
      %c0_32 = arith.constant 0 : index
      %55 = vector.load %arg10[%c0_31, %c0_32] : memref<8x128xf32, #tpu.memory_space<vmem>>, vector<8x128xf32>
      tpu.vector_store %arg10[%c0_31, %c0_32], %54 {strides = array<i32>} : memref<8x128xf32, #tpu.memory_space<vmem>>, vector<8x128xf32>,
    } else {
    }
    return
  }
  func.func @transform_0(%arg0: i32, %arg1: i32) -> (i32, i32) {
    %c0_i32 = arith.constant 0 : i32
    %c0_i32_0 = arith.constant 0 : i32
    return %arg0, %c0_i32 : i32, i32
  }
  func.func @transform_1(%arg0: i32, %arg1: i32) -> (i32, i32) {
    %c0_i32 = arith.constant 0 : i32
    %c0_i32_0 = arith.constant 0 : i32
    return %arg1, %c0_i32 : i32, i32
  }
  func.func @transform_2(%arg0: i32, %arg1: i32) -> (i32, i32) {
    %c0_i32 = arith.constant 0 : i32
    %c0_i32_0 = arith.constant 0 : i32
    %c0_i32_1 = arith.constant 0 : i32
    return %c0_i32, %c0_i32_0 : i32, i32
  }
  func.func @transform_3(%arg0: i32, %arg1: i32) -> (i32, i32) {
    %c0_i32 = arith.constant 0 : i32
    %c0_i32_0 = arith.constant 0 : i32
    %c0_i32_1 = arith.constant 0 : i32
    return %c0_i32, %c0_i32_0 : i32, i32
  }
  func.func @transform_4(%arg0: i32, %arg1: i32) -> (i32, i32) {
    %c0_i32 = arith.constant 0 : i32
    %c0_i32_0 = arith.constant 0 : i32
    %c0_i32_1 = arith.constant 0 : i32
    return %c0_i32, %c0_i32_0 : i32, i32
  }
  func.func @transform_5(%arg0: i32, %arg1: i32) -> (i32, i32) {
    %c0_i32 = arith.constant 0 : i32
    %c0_i32_0 = arith.constant 0 : i32
    %c0_i32_1 = arith.constant 0 : i32
    return %c0_i32, %c0_i32_0 : i32, i32
  }
  func.func @transform_6(%arg0: i32, %arg1: i32) -> (i32, i32) {
    %c0_i32 = arith.constant 0 : i32
    %c0_i32_0 = arith.constant 0 : i32
    %c0_i32_1 = arith.constant 0 : i32
    return %c0_i32, %c0_i32_0 : i32, i32
  }
  func.func @transform_7(%arg0: i32, %arg1: i32) -> (i32, i32) {
    %c0_i32 = arith.constant 0 : i32
    %c0_i32_0 = arith.constant 0 : i32
    %c0_i32_1 = arith.constant 0 : i32
    return %c0_i32, %c0_i32_0 : i32, i32
  }
  func.func @transform_8(%arg0: i32, %arg1: i32) -> (i32, i32) {
    %c0_i32 = arith.constant 0 : i32
    %c0_i32_0 = arith.constant 0 : i32
    return %arg0, %c0_i32 : i32, i32
  }
}

</mosaic_0001>

<bundles_post_ra>
// kernel: tpu_custom_call.1
= control target key start
LH: loop header
LB: loop body
LE: loop exit
PB: predicated region body
PF: predicated region fallthrough
CT: control target
= control target key end

     0   :  { %13 = vsyncpa [#allocation4], 0  ;;  %s1100_s0 = inlined_call_operand.vmem [shape: f32[8,3], index: 0, kind: input, shape index: {}]   ;;  %s1101_s1 = inlined_call_operand.hbm [shape: bf16[128,128], index: 1, kind: input, shape index: {}]   ;;  %s1102_s2 = inlined_call_operand.hbm [shape: bf16[128,128], index: 2, kind: input, shape index: {}]   ;;  %s1103_s3 = inlined_call_operand.vmem [shape: f32[1,128], index: 3, kind: input, shape index: {}]   ;;  %s1104_s4 = inlined_call_operand.hbm [shape: bf16[128,128], index: 4, kind: input, shape index: {}]   ;;  %s1105_s5 = inlined_call_operand.vmem [shape: f32[1,128], index: 5, kind: input, shape index: {}]   ;;  %s1106_s6 = inlined_call_operand.hbm [shape: bf16[128,128], index: 6, kind: input, shape index: {}]   ;;  %s1107_s7 = inlined_call_operand.vmem [shape: f32[1,128], index: 7, kind: input, shape index: {}]   ;;  %s1108_s8 = inlined_call_operand.hbm [shape: f32[8,128], index: 8, kind: output, shape index: {}]  }
   0x1   :  { %14 = vsyncpa [#allocation7], 0 }
   0x2   :  { %15 = vsyncpa [#allocation10], 0 }
   0x3   :  { %16 = vsyncpa [#allocation5], 0  ;;  %s904_s27 = smov [#allocation6]   ;;  %s905_s29 = smov [#allocation3]  }
   0x4   :  { %s36_s28 = sshll.u32 %s904_s27, 4  ;;  %s24_s30 = sshll.u32 %s905_s29, 4  ;;  %s37_s28 = int_to_ptr.vmem [resolvable:$true] %s36_s28  ;;  %s962_s30 = int_to_ptr.vmem [resolvable:$true] %s24_s30 }
   0x5   :  { %s786_s11 = scalar_lea.hbm %s1102_s2, 1024 }
   0x6   :  { %p787_p0 = scmp.ne.s32.totalorder %s1102_s2, %s786_s11  ;;  %p790_p1 = scmp.lt.u32.totalorder %s786_s11, %s1102_s2 }
   0x8   :  { %p792_p2 = pnand %p790_p1, %p787_p0 }
   0xa   :  { %795 = shalt.err (!%p792_p2)
}
   0xb   :  { %s796_s16 = scalar_lea.vmem %s37_s28, 1024  ;;  %p801_p4 = scmp.lt.s32.totalorder %s37_s28, %s37_s28 }
   0xc   :  { %p797_p3 = scmp.ne.s32.totalorder %s37_s28, %s796_s16  ;;  %p802_p5 = scmp.lt.s32.totalorder %s796_s16, %s796_s16 }
   0xe   :  { %p803_p6 = por %p802_p5, %p801_p4 }
  0x10   :  { %p804_p7 = pnand %p803_p6, %p797_p3 }
  0x12   :  { %807 = shalt.err (!%p804_p7)
}
  0x13   :  { %s906_s17 = smov 64   ;;  %s907_s18 = smov 4  }
  0x14   :  { %42 = dma.hbm_to_vmem [thread:$0]  %s1102_s2, 1024, %s37_s28, [#allocation7], %s906_s17, %s906_s17, %s907_s18  }
  0x15   :  { %s808_s23 = scalar_lea.hbm %s1101_s1, 1024 }
  0x16   :  { %p809_p8 = scmp.ne.s32.totalorder %s1101_s1, %s808_s23  ;;  %p812_p9 = scmp.lt.u32.totalorder %s808_s23, %s1101_s1 }
  0x18   :  { %p814_p10 = pnand %p812_p9, %p809_p8 }
  0x1a   :  { %817 = shalt.err (!%p814_p10)
}
  0x1b   :  { %s818_s29 = scalar_lea.vmem %s962_s30, 1024  ;;  %p823_p12 = scmp.lt.s32.totalorder %s962_s30, %s962_s30 }
  0x1c   :  { %p819_p11 = scmp.ne.s32.totalorder %s962_s30, %s818_s29  ;;  %p824_p13 = scmp.lt.s32.totalorder %s818_s29, %s818_s29 }
  0x1e   :  { %p825_p0 = por %p824_p13, %p823_p12 }
  0x20   :  { %p826_p1 = pnand %p825_p0, %p819_p11 }
  0x22   :  { %829 = shalt.err (!%p826_p1)
}
  0x23   :  { %30 = dma.hbm_to_vmem [thread:$0]  %s1101_s1, 1024, %s962_s30, [#allocation4], %s906_s17, %s906_s17, %s907_s18  }
  0x24   :  { %s908_s9 = smov [#allocation8]   ;;  %s909_s11 = smov [#allocation9]  }
  0x25   :  { %s50_s10 = sshll.u32 %s908_s9, 4  ;;  %s64_s12 = sshll.u32 %s909_s11, 4  ;;  %s51_s10 = int_to_ptr.vmem [resolvable:$true] %s50_s10  ;;  %s999_s12 = int_to_ptr.vmem [resolvable:$true] %s64_s12 }
  0x26   :  { %s830_s15 = scalar_lea.hbm %s1104_s4, 1024 }
  0x27   :  { %p831_p2 = scmp.ne.s32.totalorder %s1104_s4, %s830_s15  ;;  %p834_p3 = scmp.lt.u32.totalorder %s830_s15, %s1104_s4 }
  0x29   :  { %p836_p4 = pnand %p834_p3, %p831_p2 }
  0x2b   :  { %839 = shalt.err (!%p836_p4)
}
  0x2c   :  { %s840_s1 = scalar_lea.vmem %s51_s10, 1024  ;;  %p845_p6 = scmp.lt.s32.totalorder %s51_s10, %s51_s10 }
  0x2d   :  { %p841_p5 = scmp.ne.s32.totalorder %s51_s10, %s840_s1  ;;  %p846_p7 = scmp.lt.s32.totalorder %s840_s1, %s840_s1 }
  0x2f   :  { %p847_p8 = por %p846_p7, %p845_p6 }
  0x31   :  { %p848_p9 = pnand %p847_p8, %p841_p5 }
  0x33   :  { %851 = shalt.err (!%p848_p9)
}
  0x34   :  { %56 = dma.hbm_to_vmem [thread:$0]  %s1104_s4, 1024, %s51_s10, [#allocation7], %s906_s17, %s906_s17, %s907_s18  }
  0x35   :  { %s852_s25 = scalar_lea.hbm %s1106_s6, 1024 }
  0x36   :  { %p853_p10 = scmp.ne.s32.totalorder %s1106_s6, %s852_s25  ;;  %p856_p11 = scmp.lt.u32.totalorder %s852_s25, %s1106_s6 }
  0x38   :  { %p858_p12 = pnand %p856_p11, %p853_p10 }
  0x3a   :  { %861 = shalt.err (!%p858_p12)
}
  0x3b   :  { %s862_s28 = scalar_lea.vmem %s999_s12, 1024  ;;  %p867_p0 = scmp.lt.s32.totalorder %s999_s12, %s999_s12 }
  0x3c   :  { %p863_p13 = scmp.ne.s32.totalorder %s999_s12, %s862_s28  ;;  %p868_p1 = scmp.lt.s32.totalorder %s862_s28, %s862_s28 }
  0x3e   :  { %p869_p2 = por %p868_p1, %p867_p0 }
  0x40   :  { %p870_p3 = pnand %p869_p2, %p863_p13 }
  0x42   :  { %873 = shalt.err (!%p870_p3)
}
  0x43   :  { %70 = dma.hbm_to_vmem [thread:$0]  %s1106_s6, 1024, %s999_s12, [#allocation10], %s906_s17, %s906_s17, %s907_s18  }
  0x44   :  { %896 = dma.done.wait [#allocation4], 1024  }
  0x45   :  { %897 = vsyncadd [#allocation4], 4294966272 }
  0x46   :  { %898 = dma.done.wait [#allocation7], 2048  }
  0x47   :  { %899 = vsyncadd [#allocation7], 4294965248 }
  0x48   :  { %900 = dma.done.wait [#allocation10], 1024  }
  0x49   :  { %901 = vsyncadd [#allocation10], 4294966272  ;;  %v910_v0 = vmov 0   ;;  %v911_v1 = vmov 0.0   ;;  %v91_v2 = vld [vmem:[%s1100_s0] sm:$0xff]  ;;  %v755_v6 = vld [vmem:[#allocation3 + $0x8] sm:$0xff]   ;;  %v94_v22 = vlaneseq }
  0x4a   :  { %750 = vset.pattern.permute.xlu0 %v910_v0  ;;  %655 = vmatprep.subr.bf16.mxu0 %v911_v1  ;;  %v735_v3 = vtrunc.f32 %v91_v2  ;;  %v754_v4 = vld [vmem:[#allocation3] sm:$0xff]   ;;  %v756_v7 = vld [vmem:[#allocation3 + $0x10] sm:$0xff]   ;;  %v912_v8 = vmov 1   ;;  %v757_v9 = vld [vmem:[#allocation3 + $0x18] sm:$0xff]   ;;  %vm913_vm0 = vmmov 0   ;;  %v914_v12 = vmov 2  }
  0x4b   :  { %675 = vmatprep.subr.bf16.mxu1 %v911_v1  ;;  %656 = vmatpush3.bf16.msra.mxu0 %v754_v4  ;;  %v762_v10 = vld [vmem:[#allocation6] sm:$0xff]   ;;  %v763_v13 = vld [vmem:[#allocation6 + $0x8] sm:$0xff]   ;;  %v764_v15 = vld [vmem:[#allocation6 + $0x10] sm:$0xff]   ;;  %v95_v24 = vand.u32 127, %v94_v22  ;;  %v915_v26 = vmov 1.0|1.0  }
  0x4c   :  { %v736_v5 = vcvt.f32.s32 %v735_v3  ;;  %657 = vmatprep.subr.bf16.mxu0 %v911_v1  ;;  %671 = vmatprep.mubr.msk.bf16.mxu0 %vm913_vm0, %v911_v1  ;;  %v758_v11 = vld [vmem:[#allocation3 + $0x20] sm:$0xff]   ;;  %v759_v14 = vld [vmem:[#allocation3 + $0x28] sm:$0xff]   ;;  %v760_v16 = vld [vmem:[#allocation3 + $0x30] sm:$0xff]   ;;  %s916_s13 = smov [#allocation11]  }
  0x4d   :  { %691 = vmatprep.mubr.msk.bf16.mxu1 %vm913_vm0, %v911_v1  ;;  %752 = vset.pattern.permute.xlu1 %v914_v12  ;;  %v765_v17 = vld [vmem:[#allocation6 + $0x18] sm:$0xff]   ;;  %v766_v19 = vld [vmem:[#allocation6 + $0x20] sm:$0xff]   ;;  %v767_v20 = vld [vmem:[#allocation6 + $0x28] sm:$0xff]   ;;  %s571_s14 = sshll.u32 %s916_s13, 4  ;;  %s572_s14 = int_to_ptr.vmem [resolvable:$true] %s571_s14 }
  0x4e   :  { %99 = vperm.xlu0 %750, %v736_v5   ;;  %222 = vperm.xlu1 %752, %v91_v2   ;;  %v761_v18 = vld [vmem:[#allocation3 + $0x38] sm:$0xff]   ;;  %v768_v21 = vld [vmem:[#allocation6 + $0x30] sm:$0xff]   ;;  %v770_v28 = vld [vmem:[#allocation8] sm:$0xff]   ;;  %p879_p5 = scmp.lt.s32.totalorder %s572_s14, %s572_s14 }
  0x4f   :  { %658 = vmatpush3.bf16.msra.mxu0 %v755_v6  ;;  %676 = vmatpush3.bf16.msra.mxu1 %v762_v10  ;;  %v769_v27 = vld [vmem:[#allocation6 + $0x38] sm:$0xff]   ;;  %v771_v29 = vld [vmem:[#allocation8 + $0x8] sm:$0xff]   ;;  %v772_v30 = vld [vmem:[#allocation8 + $0x10] sm:$0xff]  }
  0x50   :  { %659 = vmatprep.subr.bf16.mxu0 %v911_v1  ;;  %677 = vmatprep.subr.bf16.mxu1 %v911_v1  ;;  %v773_v31 = vld [vmem:[#allocation8 + $0x18] sm:$0xff]   ;;  %v774_v32 = vld [vmem:[#allocation8 + $0x20] sm:$0xff]   ;;  %v775_v33 = vld [vmem:[#allocation8 + $0x28] sm:$0xff]  }
  0x51   :  { %v776_v41 = vld [vmem:[#allocation8 + $0x30] sm:$0xff]   ;;  %v777_v42 = vld [vmem:[#allocation8 + $0x38] sm:$0xff]   ;;  %v778_v43 = vld [vmem:[#allocation9] sm:$0xff]  }
  0x52   :  { %751 = vset.pattern.permute.xlu0 %v912_v8  ;;  %v779_v44 = vld [vmem:[#allocation9 + $0x8] sm:$0xff]   ;;  %v780_v45 = vld [vmem:[#allocation9 + $0x10] sm:$0xff]   ;;  %v781_v46 = vld [vmem:[#allocation9 + $0x18] sm:$0xff]  }
  0x53   :  { %103 = vperm.xlu0 %751, %v736_v5   ;;  %660 = vmatpush3.bf16.msra.mxu0 %v756_v7  ;;  %v782_v47 = vld [vmem:[#allocation9 + $0x20] sm:$0xff]   ;;  %v783_v48 = vld [vmem:[#allocation9 + $0x28] sm:$0xff]   ;;  %v784_v57 = vld [vmem:[#allocation9 + $0x30] sm:$0xff]  }
  0x54   :  { %661 = vmatprep.subr.bf16.mxu0 %v911_v1  ;;  %678 = vmatpush3.bf16.msra.mxu1 %v763_v13  ;;  %v592_v49 = vld [vmem:[%s1103_s3] ss:$0 sm:$0xff]  ;;  %v785_v58 = vld [vmem:[#allocation9 + $0x38] sm:$0xff]  }
  0x55   :  { %679 = vmatprep.subr.bf16.mxu1 %v911_v1  ;;  %v601_v59 = vld [vmem:[%s1105_s5] ss:$0 sm:$0xff]  ;;  %s874_s5 = scalar_lea.vmem %s572_s14, 128 }
  0x56   :  { %v610_v4 = vld [vmem:[%s1107_s7] ss:$0 sm:$0xff]  ;;  %p875_p4 = scmp.ne.s32.totalorder %s572_s14, %s874_s5  ;;  %p880_p6 = scmp.lt.s32.totalorder %s874_s5, %s874_s5 }
  0x57   :  { %753 = vset.pattern.permute.xlu0 %v914_v12  ;;  %662 = vmatpush3.bf16.msra.mxu0 %v757_v9 }
  0x58   :  { %663 = vmatprep.subr.bf16.mxu0 %v911_v1  ;;  %680 = vmatpush3.bf16.msra.mxu1 %v764_v15  ;;  %p881_p7 = por %p880_p6, %p879_p5 }
  0x59   :  { %681 = vmatprep.subr.bf16.mxu1 %v911_v1 }
  0x5a   :  { %p882_p8 = pnand %p881_p7, %p875_p4 }
  0x5b   :  { %664 = vmatpush3.bf16.msra.mxu0 %v758_v11 }
  0x5c   :  { %665 = vmatprep.subr.bf16.mxu0 %v911_v1  ;;  %682 = vmatpush3.bf16.msra.mxu1 %v765_v17 }
  0x5d   :  { %683 = vmatprep.subr.bf16.mxu1 %v911_v1 }
  0x5f   :  { %666 = vmatpush3.bf16.msra.mxu0 %v759_v14 }
  0x60   :  { %667 = vmatprep.subr.bf16.mxu0 %v911_v1  ;;  %684 = vmatpush3.bf16.msra.mxu1 %v766_v19 }
  0x61   :  { %685 = vmatprep.subr.bf16.mxu1 %v911_v1 }
  0x63   :  { %668 = vmatpush3.bf16.msra.mxu0 %v760_v16 }
  0x64   :  { %669 = vmatprep.subr.bf16.mxu0 %v911_v1  ;;  %686 = vmatpush3.bf16.msra.mxu1 %v767_v20 }
  0x65   :  { %687 = vmatprep.subr.bf16.mxu1 %v911_v1 }
  0x67   :  { %670 = vmatpush3.bf16.msra.mxu0 %v761_v18 }
  0x68   :  { %695 = vmatprep.subr.bf16.mxu0 %v911_v1  ;;  %688 = vmatpush3.bf16.msra.mxu1 %v768_v21 }
  0x69   :  { %689 = vmatprep.subr.bf16.mxu1 %v911_v1 }
  0x6c   :  { %690 = vmatpush3.bf16.msra.mxu1 %v769_v27 }
  0x6d   :  { %715 = vmatprep.subr.bf16.mxu1 %v911_v1 }
  0xcd   :  { %v100_v23 = vpop.permute.xlu0 %99  ;;  %v223_v34 = vpop.permute.xlu1 %222 }
  0xce   :  { %vm101_vm1 = vcmp.ge.s32.totalorder %v95_v24, %v100_v23 }
  0xd2   :  { %v104_v25 = vpop.permute.xlu0 %103 }
  0xd3   :  { %vm105_vm2 = vcmp.lt.s32.totalorder %v95_v24, %v104_v25 }
  0xd4   :  { %vm106_vm3 = vmand %vm101_vm1, %vm105_vm2 }
  0xd5   :  { %vm590_vm4 = vmpackc.low %vm106_vm3, %vm106_vm3 }
  0xd6   :  { %672 = vmatmul.mubr.msk.bf16.vlgmr.msra.gmra.mrb[0].mxu0 %vm590_vm4, %v915_v26 }
  0xd7   :  { %711 = vmatprep.mubr.msk.bf16.mxu0 %vm913_vm0, %v911_v1  ;;  %696 = vmatpush3.bf16.msra.mxu0 %v770_v28 }
  0xd8   :  { %697 = vmatprep.subr.bf16.mxu0 %v911_v1 }
  0xdb   :  { %698 = vmatpush3.bf16.msra.mxu0 %v771_v29 }
  0xdc   :  { %699 = vmatprep.subr.bf16.mxu0 %v911_v1 }
  0xdf   :  { %700 = vmatpush3.bf16.msra.mxu0 %v772_v30 }
  0xe0   :  { %701 = vmatprep.subr.bf16.mxu0 %v911_v1 }
  0xe3   :  { %702 = vmatpush3.bf16.msra.mxu0 %v773_v31 }
  0xe4   :  { %703 = vmatprep.subr.bf16.mxu0 %v911_v1 }
  0xe7   :  { %704 = vmatpush3.bf16.msra.mxu0 %v774_v32 }
  0xe8   :  { %705 = vmatprep.subr.bf16.mxu0 %v911_v1 }
  0xeb   :  { %706 = vmatpush3.bf16.msra.mxu0 %v775_v33 }
  0xec   :  { %707 = vmatprep.subr.bf16.mxu0 %v911_v1 }
  0xef   :  { %708 = vmatpush3.bf16.msra.mxu0 %v776_v41 }
  0xf0   :  { %709 = vmatprep.subr.bf16.mxu0 %v911_v1 }
  0xf3   :  { %710 = vmatpush3.bf16.msra.mxu0 %v777_v42 }
 0x1a9   :  { %v208_v35 = vpop.f32.mrb[0].mxu0 }
 0x1aa   :  { %v225_v36 = vmul.f32 %v223_v34, %v208_v35  ;;  %v673_v37 = vpop.f32.mrb[1].mxu0 }
 0x1ab   :  { %v211_v38 = vpop.f32.mrb[2].mxu0 }
 0x1ac   :  { %v226_v39 = vpack.c.bf16 %v225_v36, %v225_v36  ;;  %v674_v40 = vpop.f32.mrb[3].mxu0 }
 0x1ae   :  { %692 = vmatmul.mubr.bf16.vlgmr.msra.gmra.mrb[0].mxu1 %v226_v39 }
 0x1af   :  { %731 = vmatprep.mubr.msk.bf16.mxu1 %vm913_vm0, %v911_v1  ;;  %716 = vmatpush3.bf16.msra.mxu1 %v778_v43 }
 0x1b0   :  { %717 = vmatprep.subr.bf16.mxu1 %v911_v1 }
 0x1b3   :  { %718 = vmatpush3.bf16.msra.mxu1 %v779_v44 }
 0x1b4   :  { %719 = vmatprep.subr.bf16.mxu1 %v911_v1 }
 0x1b7   :  { %720 = vmatpush3.bf16.msra.mxu1 %v780_v45 }
 0x1b8   :  { %721 = vmatprep.subr.bf16.mxu1 %v911_v1 }
 0x1bb   :  { %722 = vmatpush3.bf16.msra.mxu1 %v781_v46 }
 0x1bc   :  { %723 = vmatprep.subr.bf16.mxu1 %v911_v1 }
 0x1bf   :  { %724 = vmatpush3.bf16.msra.mxu1 %v782_v47 }
 0x1c0   :  { %725 = vmatprep.subr.bf16.mxu1 %v911_v1 }
 0x1c3   :  { %726 = vmatpush3.bf16.msra.mxu1 %v783_v48 }
 0x1c4   :  { %727 = vmatprep.subr.bf16.mxu1 %v911_v1 }
 0x1c7   :  { %728 = vmatpush3.bf16.msra.mxu1 %v784_v57 }
 0x1c8   :  { %729 = vmatprep.subr.bf16.mxu1 %v911_v1 }
 0x1cb   :  { %730 = vmatpush3.bf16.msra.mxu1 %v785_v58 }
 0x281   :  { %v332_v50 = vpop.f32.mrb[0].mxu1 }
 0x282   :  { %v333_v51 = vadd.f32 %v592_v49, %v332_v50  ;;  %v693_v52 = vpop.f32.mrb[1].mxu1 }
 0x283   :  { %v335_v53 = vpop.f32.mrb[2].mxu1 }
 0x284   :  { %v338_v54 = vmax.f32 %v333_v51, 0.0  ;;  %v694_v55 = vpop.f32.mrb[3].mxu1 }
 0x286   :  { %v339_v56 = vpack.c.bf16 %v338_v54, %v338_v54 }
 0x288   :  { %712 = vmatmul.mubr.bf16.vlgmr.msra.gmra.mrb[4].mxu0 %v339_v56 }
 0x35b   :  { %v445_v60 = vpop.f32.mrb[4].mxu0 }
 0x35c   :  { %v446_v61 = vadd.f32 %v601_v59, %v445_v60  ;;  %v713_v62 = vpop.f32.mrb[5].mxu0 }
 0x35d   :  { %v448_v63 = vpop.f32.mrb[6].mxu0 }
 0x35e   :  { %v451_v0 = vmax.f32 %v446_v61, 0.0  ;;  %v714_v2 = vpop.f32.mrb[7].mxu0 }
 0x360   :  { %v452_v3 = vpack.c.bf16 %v451_v0, %v451_v0 }
 0x362   :  { %732 = vmatmul.mubr.bf16.vlgmr.msra.gmra.mrb[4].mxu1 %v452_v3 }
 0x435   :  { %v558_v1 = vpop.f32.mrb[4].mxu1 }
 0x436   :  { %v559_v5 = vadd.f32 %v610_v4, %v558_v1  ;;  %v733_v6 = vpop.f32.mrb[5].mxu1 }
 0x437   :  { %v561_v7 = vpop.f32.mrb[6].mxu1 }
 0x438   :  { %564 = vst [vmem:[#allocation11] sm:$0xff] %v559_v5  ;;  %v734_v8 = vpop.f32.mrb[7].mxu1 }
 0x439   :  { %885 = shalt.err (!%p882_p8)
}
 0x43a   :  { %s886_s7 = scalar_lea.hbm %s1108_s8, 128 }
 0x43b   :  { %p887_p9 = scmp.ne.s32.totalorder %s1108_s8, %s886_s7  ;;  %p890_p10 = scmp.lt.u32.totalorder %s886_s7, %s1108_s8 }
 0x43d   :  { %p892_p11 = pnand %p890_p10, %p887_p9 }
 0x43f   :  { %895 = shalt.err (!%p892_p11)
}
 0x440   :  { %574 = dma.vmem_to_hbm [thread:$0]  %s572_s14, 128, %s1108_s8, [#allocation5]  }
 0x441   :  { %902 = dma.done.wait [#allocation5], 128  }
 0x442   :  { %903 = vsyncadd [#allocation5], 4294967168 }
 0x443   :  { %578 = vsyncpa [#allocation4], 1 }
 0x444   :  { %579 = vsyncpa [#allocation7], 1 }
 0x445   :  { %580 = vsyncpa [#allocation10], 1 }
 0x446   :  { %581 = vsyncpa [#allocation5], 1 }

</bundles_post_ra>
